<compile_context>
chip_gen: v6e
topology: v6e:2x2x1
jax: 0.10.0
libtpu: 0.0.40
codegen_flags: <defaults>
</compile_context>

<pallas_src>
import functools

import jax
import jax.numpy as jnp
from jax.experimental import pallas as pl
from jax.experimental.pallas import tpu as pltpu

EPS = 1e-5

_PARALLEL_1D = pltpu.CompilerParams(dimension_semantics=("parallel",))


# -----------------------------------------------------------------------------
# Kernels
# -----------------------------------------------------------------------------
def _dw_conv_stats_kernel(x_ref, wdw_ref, y_ref, s_ref, ss_ref,
                          *, height, width, ksize, pad):
    """Depthwise KxK conv (stride 1, zero padding handled in-kernel) + BN1 partials.

    x_ref : (Cin, H*W)   one image, lanes ordered p = h*W + w (lane-dense)
    wdw   : (Cin, K*K)   depthwise taps
    y_ref : (Cin, H*W)   conv output
    s_ref, ss_ref : (Cin, 1) per-image sum / sum-of-squares (for global BN1 stats)
    """
    x = x_ref[...]                                   # (C, HW) f32
    wdw = wdw_ref[...]                               # (C, K*K)
    c, hw = x.shape

    # Flattened lane position of every element (hoisted: iotas are not CSE'd by JAX).
    lanepos = jax.lax.broadcasted_iota(jnp.int32, (c, hw), 1)
    wpos = jax.lax.rem(lanepos, width)               # column w of each lane position

    acc = jnp.zeros((c, hw), jnp.float32)
    for kh in range(ksize):
        dh = kh - pad
        for kw in range(ksize):
            dw = kw - pad
            delta = dh * width + dw                  # flattened-lane offset of this tap
            if delta == 0:
                v = x
            else:
                # Lane roll on the XLU: v[:, p] == x[:, (p + delta) % HW]; wrapped /
                # row-crossing positions are exactly the padded border -> masked below.
                v = pltpu.roll(x, shift=(-delta) % hw, axis=1)
            conds = []
            if dh < 0:
                conds.append(lanepos >= -dh * width)         # h + dh >= 0
            elif dh > 0:
                conds.append(lanepos < hw - dh * width)      # h + dh <= H-1
            if dw < 0:
                conds.append(wpos >= -dw)                    # w + dw >= 0
            elif dw > 0:
                conds.append(wpos < width - dw)              # w + dw <= W-1
            if conds:
                m = conds[0]
                for extra in conds[1:]:
                    m = jnp.logical_and(m, extra)
                v = jnp.where(m, v, 0.0)
            tap = kh * ksize + kw
            acc = acc + v * wdw[:, tap:tap + 1]              # (C,HW) * (C,1)

    y_ref[...] = acc
    # Single-pass BN statistics for this image (var finalized as E[x^2] - mu^2 later).
    s_ref[...] = jnp.sum(acc, axis=1, keepdims=True)
    ss_ref[...] = jnp.sum(acc * acc, axis=1, keepdims=True)


def _bn_relu_pointwise_stats_kernel(y_ref, a1_ref, c1_ref, wpw_ref,
                                    z_ref, s_ref, ss_ref):
    """BN1 (pre-folded scale/offset) + ReLU + 1x1 conv (MXU matmul) + BN2 partials."""
    t = jnp.maximum(y_ref[...] * a1_ref[...] + c1_ref[...], 0.0)         # (Cin, HW)
    # TODO(synk): on v6e/v7x, casting t / wpw to bf16 (keeping f32 accumulation) would
    # double MXU throughput; kept f32 for numerical parity with PyTorch and for v5e.
    z = jnp.dot(wpw_ref[...], t, preferred_element_type=jnp.float32)      # (Cout, HW)
    z_ref[...] = z
    s_ref[...] = jnp.sum(z, axis=1, keepdims=True)
    ss_ref[...] = jnp.sum(z * z, axis=1, keepdims=True)


def _bn_relu_kernel(z_ref, a2_ref, c2_ref, o_ref):
    """Final BN2 apply (pre-folded scale/offset) + ReLU."""
    o_ref[...] = jnp.maximum(z_ref[...] * a2_ref[...] + c2_ref[...], 0.0)


# -----------------------------------------------------------------------------
# Wrapper
# -----------------------------------------------------------------------------
def _finalize_bn(s, ss, gamma, beta, count):
    """Reduce per-image partials and fold global batch stats + affine into scale/offset."""
    mean = jnp.sum(s, axis=0) / count                        # (C, 1)
    ex2 = jnp.sum(ss, axis=0) / count
    var = jnp.maximum(ex2 - mean * mean, 0.0)                # biased variance (training BN)
    scale = gamma * jax.lax.rsqrt(var + EPS)
    offset = beta - mean * scale
    return scale, offset


def mobilenet_block(x_nchw, params, *, kernel_size=3, padding=1):
    """MobileNetBlock forward. x_nchw: (N, Cin, H, W) f32 -> (N, Cout, H, W) f32."""
    wdw, g1, b1, wpw, g2, b2 = params
    n, cin, h, w = x_nchw.shape
    cout = wpw.shape[0]
    hw = h * w
    assert kernel_size == 2 * padding + 1, "stride-1 'same' depthwise conv assumed"

    # Channel-major layout: NCHW is already (N, C, H, W) -> pure reshape, no transpose.
    x2 = x_nchw.reshape(n, cin, hw)
    wdw2 = wdw.reshape(cin, kernel_size * kernel_size)

    # ---- pass 1: depthwise conv + partial BN1 stats (grid over batch, pipelined) ----
    k1 = functools.partial(_dw_conv_stats_kernel,
                           height=h, width=w, ksize=kernel_size, pad=padding)
    y, s1, ss1 = pl.pallas_call(
        k1,
        grid=(n,),
        in_specs=[
            pl.BlockSpec((None, cin, hw), lambda i: (i, 0, 0)),
            pl.BlockSpec((cin, kernel_size * kernel_size), lambda i: (0, 0)),
        ],
        out_specs=[
            pl.BlockSpec((None, cin, hw), lambda i: (i, 0, 0)),
            pl.BlockSpec((None, cin, 1), lambda i: (i, 0, 0)),
            pl.BlockSpec((None, cin, 1), lambda i: (i, 0, 0)),
        ],
        out_shape=[
            jax.ShapeDtypeStruct((n, cin, hw), jnp.float32),
            jax.ShapeDtypeStruct((n, cin, 1), jnp.float32),
            jax.ShapeDtypeStruct((n, cin, 1), jnp.float32),
        ],
        compiler_params=_PARALLEL_1D,
    )(x2, wdw2)

    a1, c1 = _finalize_bn(s1, ss1, g1, b1, float(n * hw))

    # ---- pass 2: BN1 + ReLU + pointwise 1x1 conv (MXU) + partial BN2 stats ----
    z, s2, ss2 = pl.pallas_call(
        _bn_relu_pointwise_stats_kernel,
        grid=(n,),
        in_specs=[
            pl.BlockSpec((None, cin, hw), lambda i: (i, 0, 0)),
            pl.BlockSpec((cin, 1), lambda i: (0, 0)),
            pl.BlockSpec((cin, 1), lambda i: (0, 0)),
            pl.BlockSpec((cout, cin), lambda i: (0, 0)),
        ],
        out_specs=[
            pl.BlockSpec((None, cout, hw), lambda i: (i, 0, 0)),
            pl.BlockSpec((None, cout, 1), lambda i: (i, 0, 0)),
            pl.BlockSpec((None, cout, 1), lambda i: (i, 0, 0)),
        ],
        out_shape=[
            jax.ShapeDtypeStruct((n, cout, hw), jnp.float32),
            jax.ShapeDtypeStruct((n, cout, 1), jnp.float32),
            jax.ShapeDtypeStruct((n, cout, 1), jnp.float32),
        ],
        compiler_params=_PARALLEL_1D,
    )(y, a1, c1, wpw)

    a2, c2 = _finalize_bn(s2, ss2, g2, b2, float(n * hw))

    # ---- pass 3: BN2 + ReLU ----
    out = pl.pallas_call(
        _bn_relu_kernel,
        grid=(n,),
        in_specs=[
            pl.BlockSpec((None, cout, hw), lambda i: (i, 0, 0)),
            pl.BlockSpec((cout, 1), lambda i: (0, 0)),
            pl.BlockSpec((cout, 1), lambda i: (0, 0)),
        ],
        out_specs=pl.BlockSpec((None, cout, hw), lambda i: (i, 0, 0)),
        out_shape=jax.ShapeDtypeStruct((n, cout, hw), jnp.float32),
        compiler_params=_PARALLEL_1D,
    )(z, a2, c2)

    # (N, Cout, H*W) -> NCHW is again a pure reshape.
    return out.reshape(n, cout, h, w)


# -----------------------------------------------------------------------------
# Params / reference / demo
# -----------------------------------------------------------------------------
def init_params(key, in_channels, out_channels, kernel_size=3):
    k1, k2, k3, k4, k5, k6 = jax.random.split(key, 6)
    # depthwise conv weight, PyTorch shape (Cin,1,kh,kw) -> (Cin, kh, kw)
    wdw = 0.1 * jax.random.normal(k1, (in_channels, kernel_size, kernel_size), jnp.float32)
    # pointwise conv weight, PyTorch shape (Cout,Cin,1,1) -> (Cout, Cin)
    wpw = 0.1 * jax.random.normal(k2, (out_channels, in_channels), jnp.float32)
    # BN affine params (PyTorch init is gamma=1, beta=0; perturbed to exercise the math).
    g1 = 1.0 + 0.05 * jax.random.normal(k3, (in_channels, 1), jnp.float32)
    b1 = 0.05 * jax.random.normal(k4, (in_channels, 1), jnp.float32)
    g2 = 1.0 + 0.05 * jax.random.normal(k5, (out_channels, 1), jnp.float32)
    b2 = 0.05 * jax.random.normal(k6, (out_channels, 1), jnp.float32)
    return wdw, g1, b1, wpw, g2, b2


def _reference_forward(x_nchw, params, *, kernel_size=3, padding=1):
    """Plain-JAX reference (pad + shifted adds, two-pass training-mode BN)."""
    wdw, g1, b1, wpw, g2, b2 = params
    n, cin, h, w = x_nchw.shape
    x = jnp.transpose(x_nchw, (0, 2, 3, 1))                       # NHWC
    xp = jnp.pad(x, ((0, 0), (padding, padding), (padding, padding), (0, 0)))
    acc = jnp.zeros((n, h, w, cin), jnp.float32)
    for kh in range(kernel_size):
        for kw in range(kernel_size):
            acc = acc + xp[:, kh:kh + h, kw:kw + w, :] * wdw[:, kh, kw]

    def bn_relu(t, g, b):
        mu = jnp.mean(t, axis=(0, 1, 2), keepdims=True)
        var = jnp.mean((t - mu) ** 2, axis=(0, 1, 2), keepdims=True)
        out = (t - mu) * jax.lax.rsqrt(var + EPS)
        out = out * g.reshape(1, 1, 1, -1) + b.reshape(1, 1, 1, -1)
        return jnp.maximum(out, 0.0)

    y = bn_relu(acc, g1, b1)
    z = jnp.einsum("nhwc,oc->nhwo", y, wpw)
    z = bn_relu(z, g2, b2)
    return jnp.transpose(z, (0, 3, 1, 2))                         # back to NCHW


if __name__ == "__main__":
    key = jax.random.PRNGKey(0)
    kx, kp = jax.random.split(key)

    N, CIN, COUT, H, W = 2, 8, 16, 16, 16
    x = jax.random.normal(kx, (N, CIN, H, W), jnp.float32)        # NCHW like PyTorch
    params = init_params(kp, CIN, COUT, kernel_size=3)

    out = jax.block_until_ready(mobilenet_block(x, params, kernel_size=3, padding=1))
    assert out.shape == (N, COUT, H, W), out.shape

    ref = jax.block_until_ready(_reference_forward(x, params, kernel_size=3, padding=1))
    max_err = float(jnp.max(jnp.abs(out - ref)))
    assert jnp.allclose(out, ref, rtol=2e-3, atol=2e-3), f"max abs err {max_err}"
    print("KERNEL_OK")
</pallas_src>

<mosaic_0001>
module attributes {stable_mosaic.version = 11 : i64} {
  func.func @_dw_conv_stats_kernel(%arg0: i32, %arg1: memref<1x8x256xf32, #tpu.memory_space<vmem>>, %arg2: memref<8x9xf32, #tpu.memory_space<vmem>>, %arg3: memref<1x8x256xf32, #tpu.memory_space<vmem>>, %arg4: memref<1x8x1xf32, #tpu.memory_space<vmem>>, %arg5: memref<1x8x1xf32, #tpu.memory_space<vmem>>) attributes {dimension_semantics = [#tpu.dimension_semantics<parallel>], iteration_bounds = array<i64: 2>, scalar_prefetch = 0 : i64, scratch_operands = 0 : i64, tpu.core_type = #tpu.core_type<tc>, window_params = [{transform_indices = @transform_0, window_bounds = array<i64: 1, 8, 256>}, {pipeline_mode = #tpu.pipeline_mode<synchronous>, transform_indices = @transform_1, window_bounds = array<i64: 8, 9>}, {transform_indices = @transform_2, window_bounds = array<i64: 1, 8, 256>}, {transform_indices = @transform_3, window_bounds = array<i64: 1, 8, 1>}, {transform_indices = @transform_4, window_bounds = array<i64: 1, 8, 1>}]} {
    %c0 = arith.constant 0 : index
    %c0_0 = arith.constant 0 : index
    %c0_1 = arith.constant 0 : index
    %0 = vector.load %arg1[%c0, %c0_0, %c0_1] : memref<1x8x256xf32, #tpu.memory_space<vmem>>, vector<1x8x256xf32>
    %1 = vector.shape_cast %0 : vector<1x8x256xf32> to vector<8x256xf32>
    %c0_2 = arith.constant 0 : index
    %c0_3 = arith.constant 0 : index
    %2 = vector.load %arg2[%c0_2, %c0_3] : memref<8x9xf32, #tpu.memory_space<vmem>>, vector<8x9xf32>
    %3 = tpu.iota {dimensions = array<i32: 1>} : vector<8x256xi32>
    %c16_i32 = arith.constant 16 : i32
    %4 = vector.broadcast %c16_i32 : i32 to vector<8x256xi32>
    %5 = arith.remsi %3, %4 : vector<8x256xi32>
    %cst = arith.constant 0.000000e+00 : f32
    %6 = vector.broadcast %cst : f32 to vector<8x256xf32>
    %c17_i32 = arith.constant 17 : i32
    %7 = tpu.dynamic_rotate %1 by %c17_i32 dim 1 : vector<8x256xf32>, i32 -> vector<8x256xf32>
    %c16_i32_4 = arith.constant 16 : i32
    %8 = vector.broadcast %c16_i32_4 : i32 to vector<8x256xi32>
    %9 = arith.cmpi sge, %3, %8 : vector<8x256xi32>
    %c1_i32 = arith.constant 1 : i32
    %10 = vector.broadcast %c1_i32 : i32 to vector<8x256xi32>
    %11 = arith.cmpi sge, %5, %10 : vector<8x256xi32>
    %12 = arith.andi %9, %11 : vector<8x256xi1>
    %cst_5 = arith.constant 0.000000e+00 : f32
    %13 = vector.broadcast %cst_5 : f32 to vector<8x256xf32>
    %14 = arith.select %12, %7, %13 : vector<8x256xi1>, vector<8x256xf32>
    %15 = vector.extract_strided_slice %2 {offsets = [0, 0], sizes = [8, 1], strides = [1, 1]} : vector<8x9xf32> to vector<8x1xf32>
    %16 = vector.broadcast %15 : vector<8x1xf32> to vector<8x256xf32>
    %17 = arith.mulf %14, %16 : vector<8x256xf32>
    %18 = arith.addf %6, %17 : vector<8x256xf32>
    %c16_i32_6 = arith.constant 16 : i32
    %19 = tpu.dynamic_rotate %1 by %c16_i32_6 dim 1 : vector<8x256xf32>, i32 -> vector<8x256xf32>
    %c16_i32_7 = arith.constant 16 : i32
    %20 = vector.broadcast %c16_i32_7 : i32 to vector<8x256xi32>
    %21 = arith.cmpi sge, %3, %20 : vector<8x256xi32>
    %cst_8 = arith.constant 0.000000e+00 : f32
    %22 = vector.broadcast %cst_8 : f32 to vector<8x256xf32>
    %23 = arith.select %21, %19, %22 : vector<8x256xi1>, vector<8x256xf32>
    %24 = vector.extract_strided_slice %2 {offsets = [0, 1], sizes = [8, 1], strides = [1, 1]} : vector<8x9xf32> to vector<8x1xf32>
    %25 = vector.broadcast %24 : vector<8x1xf32> to vector<8x256xf32>
    %26 = arith.mulf %23, %25 : vector<8x256xf32>
    %27 = arith.addf %18, %26 : vector<8x256xf32>
    %c15_i32 = arith.constant 15 : i32
    %28 = tpu.dynamic_rotate %1 by %c15_i32 dim 1 : vector<8x256xf32>, i32 -> vector<8x256xf32>
    %c16_i32_9 = arith.constant 16 : i32
    %29 = vector.broadcast %c16_i32_9 : i32 to vector<8x256xi32>
    %30 = arith.cmpi sge, %3, %29 : vector<8x256xi32>
    %c15_i32_10 = arith.constant 15 : i32
    %31 = vector.broadcast %c15_i32_10 : i32 to vector<8x256xi32>
    %32 = arith.cmpi slt, %5, %31 : vector<8x256xi32>
    %33 = arith.andi %30, %32 : vector<8x256xi1>
    %cst_11 = arith.constant 0.000000e+00 : f32
    %34 = vector.broadcast %cst_11 : f32 to vector<8x256xf32>
    %35 = arith.select %33, %28, %34 : vector<8x256xi1>, vector<8x256xf32>
    %36 = vector.extract_strided_slice %2 {offsets = [0, 2], sizes = [8, 1], strides = [1, 1]} : vector<8x9xf32> to vector<8x1xf32>
    %37 = vector.broadcast %36 : vector<8x1xf32> to vector<8x256xf32>
    %38 = arith.mulf %35, %37 : vector<8x256xf32>
    %39 = arith.addf %27, %38 : vector<8x256xf32>
    %c1_i32_12 = arith.constant 1 : i32
    %40 = tpu.dynamic_rotate %1 by %c1_i32_12 dim 1 : vector<8x256xf32>, i32 -> vector<8x256xf32>
    %c1_i32_13 = arith.constant 1 : i32
    %41 = vector.broadcast %c1_i32_13 : i32 to vector<8x256xi32>
    %42 = arith.cmpi sge, %5, %41 : vector<8x256xi32>
    %cst_14 = arith.constant 0.000000e+00 : f32
    %43 = vector.broadcast %cst_14 : f32 to vector<8x256xf32>
    %44 = arith.select %42, %40, %43 : vector<8x256xi1>, vector<8x256xf32>
    %45 = vector.extract_strided_slice %2 {offsets = [0, 3], sizes = [8, 1], strides = [1, 1]} : vector<8x9xf32> to vector<8x1xf32>
    %46 = vector.broadcast %45 : vector<8x1xf32> to vector<8x256xf32>
    %47 = arith.mulf %44, %46 : vector<8x256xf32>
    %48 = arith.addf %39, %47 : vector<8x256xf32>
    %49 = vector.extract_strided_slice %2 {offsets = [0, 4], sizes = [8, 1], strides = [1, 1]} : vector<8x9xf32> to vector<8x1xf32>
    %50 = vector.broadcast %49 : vector<8x1xf32> to vector<8x256xf32>
    %51 = arith.mulf %1, %50 : vector<8x256xf32>
    %52 = arith.addf %48, %51 : vector<8x256xf32>
    %c255_i32 = arith.constant 255 : i32
    %53 = tpu.dynamic_rotate %1 by %c255_i32 dim 1 : vector<8x256xf32>, i32 -> vector<8x256xf32>
    %c15_i32_15 = arith.constant 15 : i32
    %54 = vector.broadcast %c15_i32_15 : i32 to vector<8x256xi32>
    %55 = arith.cmpi slt, %5, %54 : vector<8x256xi32>
    %cst_16 = arith.constant 0.000000e+00 : f32
    %56 = vector.broadcast %cst_16 : f32 to vector<8x256xf32>
    %57 = arith.select %55, %53, %56 : vector<8x256xi1>, vector<8x256xf32>
    %58 = vector.extract_strided_slice %2 {offsets = [0, 5], sizes = [8, 1], strides = [1, 1]} : vector<8x9xf32> to vector<8x1xf32>
    %59 = vector.broadcast %58 : vector<8x1xf32> to vector<8x256xf32>
    %60 = arith.mulf %57, %59 : vector<8x256xf32>
    %61 = arith.addf %52, %60 : vector<8x256xf32>
    %c241_i32 = arith.constant 241 : i32
    %62 = tpu.dynamic_rotate %1 by %c241_i32 dim 1 : vector<8x256xf32>, i32 -> vector<8x256xf32>
    %c240_i32 = arith.constant 240 : i32
    %63 = vector.broadcast %c240_i32 : i32 to vector<8x256xi32>
    %64 = arith.cmpi slt, %3, %63 : vector<8x256xi32>
    %c1_i32_17 = arith.constant 1 : i32
    %65 = vector.broadcast %c1_i32_17 : i32 to vector<8x256xi32>
    %66 = arith.cmpi sge, %5, %65 : vector<8x256xi32>
    %67 = arith.andi %64, %66 : vector<8x256xi1>
    %cst_18 = arith.constant 0.000000e+00 : f32
    %68 = vector.broadcast %cst_18 : f32 to vector<8x256xf32>
    %69 = arith.select %67, %62, %68 : vector<8x256xi1>, vector<8x256xf32>
    %70 = vector.extract_strided_slice %2 {offsets = [0, 6], sizes = [8, 1], strides = [1, 1]} : vector<8x9xf32> to vector<8x1xf32>
    %71 = vector.broadcast %70 : vector<8x1xf32> to vector<8x256xf32>
    %72 = arith.mulf %69, %71 : vector<8x256xf32>
    %73 = arith.addf %61, %72 : vector<8x256xf32>
    %c240_i32_19 = arith.constant 240 : i32
    %74 = tpu.dynamic_rotate %1 by %c240_i32_19 dim 1 : vector<8x256xf32>, i32 -> vector<8x256xf32>
    %c240_i32_20 = arith.constant 240 : i32
    %75 = vector.broadcast %c240_i32_20 : i32 to vector<8x256xi32>
    %76 = arith.cmpi slt, %3, %75 : vector<8x256xi32>
    %cst_21 = arith.constant 0.000000e+00 : f32
    %77 = vector.broadcast %cst_21 : f32 to vector<8x256xf32>
    %78 = arith.select %76, %74, %77 : vector<8x256xi1>, vector<8x256xf32>
    %79 = vector.extract_strided_slice %2 {offsets = [0, 7], sizes = [8, 1], strides = [1, 1]} : vector<8x9xf32> to vector<8x1xf32>
    %80 = vector.broadcast %79 : vector<8x1xf32> to vector<8x256xf32>
    %81 = arith.mulf %78, %80 : vector<8x256xf32>
    %82 = arith.addf %73, %81 : vector<8x256xf32>
    %c239_i32 = arith.constant 239 : i32
    %83 = tpu.dynamic_rotate %1 by %c239_i32 dim 1 : vector<8x256xf32>, i32 -> vector<8x256xf32>
    %c240_i32_22 = arith.constant 240 : i32
    %84 = vector.broadcast %c240_i32_22 : i32 to vector<8x256xi32>
    %85 = arith.cmpi slt, %3, %84 : vector<8x256xi32>
    %c15_i32_23 = arith.constant 15 : i32
    %86 = vector.broadcast %c15_i32_23 : i32 to vector<8x256xi32>
    %87 = arith.cmpi slt, %5, %86 : vector<8x256xi32>
    %88 = arith.andi %85, %87 : vector<8x256xi1>
    %cst_24 = arith.constant 0.000000e+00 : f32
    %89 = vector.broadcast %cst_24 : f32 to vector<8x256xf32>
    %90 = arith.select %88, %83, %89 : vector<8x256xi1>, vector<8x256xf32>
    %91 = vector.extract_strided_slice %2 {offsets = [0, 8], sizes = [8, 1], strides = [1, 1]} : vector<8x9xf32> to vector<8x1xf32>
    %92 = vector.broadcast %91 : vector<8x1xf32> to vector<8x256xf32>
    %93 = arith.mulf %90, %92 : vector<8x256xf32>
    %94 = arith.addf %82, %93 : vector<8x256xf32>
    %c0_25 = arith.constant 0 : index
    %c0_26 = arith.constant 0 : index
    %c0_27 = arith.constant 0 : index
    %95 = vector.load %arg3[%c0_25, %c0_26, %c0_27] : memref<1x8x256xf32, #tpu.memory_space<vmem>>, vector<1x8x256xf32>
    %96 = vector.shape_cast %95 : vector<1x8x256xf32> to vector<8x256xf32>
    %97 = vector.shape_cast %94 : vector<8x256xf32> to vector<1x8x256xf32>
    tpu.vector_store %arg3[%c0_25, %c0_26, %c0_27], %97 {strides = array<i32>} : memref<1x8x256xf32, #tpu.memory_space<vmem>>, vector<1x8x256xf32>,
    %cst_28 = arith.constant dense<0.000000e+00> : vector<8xf32>
    %98 = vector.multi_reduction <add>, %94, %cst_28 [1] : vector<8x256xf32> to vector<8xf32>
    %99 = vector.shape_cast %98 : vector<8xf32> to vector<8x1xf32>
    %c0_29 = arith.constant 0 : index
    %c0_30 = arith.constant 0 : index
    %c0_31 = arith.constant 0 : index
    %100 = vector.load %arg4[%c0_29, %c0_30, %c0_31] : memref<1x8x1xf32, #tpu.memory_space<vmem>>, vector<1x8x1xf32>
    %101 = vector.shape_cast %100 : vector<1x8x1xf32> to vector<8x1xf32>
    %102 = vector.shape_cast %99 : vector<8x1xf32> to vector<1x8x1xf32>
    tpu.vector_store %arg4[%c0_29, %c0_30, %c0_31], %102 {strides = array<i32>} : memref<1x8x1xf32, #tpu.memory_space<vmem>>, vector<1x8x1xf32>,
    %103 = arith.mulf %94, %94 : vector<8x256xf32>
    %cst_32 = arith.constant dense<0.000000e+00> : vector<8xf32>
    %104 = vector.multi_reduction <add>, %103, %cst_32 [1] : vector<8x256xf32> to vector<8xf32>
    %105 = vector.shape_cast %104 : vector<8xf32> to vector<8x1xf32>
    %c0_33 = arith.constant 0 : index
    %c0_34 = arith.constant 0 : index
    %c0_35 = arith.constant 0 : index
    %106 = vector.load %arg5[%c0_33, %c0_34, %c0_35] : memref<1x8x1xf32, #tpu.memory_space<vmem>>, vector<1x8x1xf32>
    %107 = vector.shape_cast %106 : vector<1x8x1xf32> to vector<8x1xf32>
    %108 = vector.shape_cast %105 : vector<8x1xf32> to vector<1x8x1xf32>
    tpu.vector_store %arg5[%c0_33, %c0_34, %c0_35], %108 {strides = array<i32>} : memref<1x8x1xf32, #tpu.memory_space<vmem>>, vector<1x8x1xf32>,
    return
  }
  func.func @transform_0(%arg0: i32) -> (i32, i32, i32) {
    %c0_i32 = arith.constant 0 : i32
    %c0_i32_0 = arith.constant 0 : i32
    %c0_i32_1 = arith.constant 0 : i32
    return %arg0, %c0_i32, %c0_i32_0 : i32, i32, i32
  }
  func.func @transform_1(%arg0: i32) -> (i32, i32) {
    %c0_i32 = arith.constant 0 : i32
    %c0_i32_0 = arith.constant 0 : i32
    %c0_i32_1 = arith.constant 0 : i32
    return %c0_i32, %c0_i32_0 : i32, i32
  }
  func.func @transform_2(%arg0: i32) -> (i32, i32, i32) {
    %c0_i32 = arith.constant 0 : i32
    %c0_i32_0 = arith.constant 0 : i32
    %c0_i32_1 = arith.constant 0 : i32
    return %arg0, %c0_i32, %c0_i32_0 : i32, i32, i32
  }
  func.func @transform_3(%arg0: i32) -> (i32, i32, i32) {
    %c0_i32 = arith.constant 0 : i32
    %c0_i32_0 = arith.constant 0 : i32
    %c0_i32_1 = arith.constant 0 : i32
    return %arg0, %c0_i32, %c0_i32_0 : i32, i32, i32
  }
  func.func @transform_4(%arg0: i32) -> (i32, i32, i32) {
    %c0_i32 = arith.constant 0 : i32
    %c0_i32_0 = arith.constant 0 : i32
    %c0_i32_1 = arith.constant 0 : i32
    return %arg0, %c0_i32, %c0_i32_0 : i32, i32, i32
  }
}

</mosaic_0001>

<bundles_post_ra>
// kernel: tpu_custom_call.1
= control target key start
LH: loop header
LB: loop body
LE: loop exit
PB: predicated region body
PF: predicated region fallthrough
CT: control target
= control target key end

     0   :  { %10 = vsyncpa [#allocation3], 0  ;;  %s1170_s0 = inlined_call_operand.hbm [shape: f32[2,8,256], index: 0, kind: input, shape index: {}]   ;;  %s1171_s1 = inlined_call_operand.hbm [shape: f32[8,9], index: 1, kind: input, shape index: {}]   ;;  %s1172_s2 = inlined_call_operand.hbm [shape: f32[2,8,256], index: 2, kind: output, shape index: {0}]   ;;  %s1173_s3 = inlined_call_operand.vmem [shape: f32[2,8,1], index: 3, kind: output, shape index: {1}]   ;;  %s1174_s4 = inlined_call_operand.vmem [shape: f32[2,8,1], index: 4, kind: output, shape index: {2}]  }
   0x1   :  { %12 = vsyncpa [#allocation3 + $0x1], 0 }
   0x2   :  { %13 = vsyncpa [#allocation6], 0 }
   0x3   :  { %14 = vsyncpa [#allocation4], 0 }
   0x4   :  { %16 = vsyncpa [#allocation4 + $0x1], 0  ;;  %s871_s15 = smov 0   ;;  %s873_s16 = smov 0  }
   0x5   :  { %s875_s17 = smov 0   ;;  %s877_s18 = smov 0  }
   0x6 LB: > { %s892_s19 = sadd.s32 4294967295, %s824_s18   ;;  %s599_s20 = sadd.s32 4294967294, %s824_s18   ;;  %s824_s18 = sphi %s877_s18, %s1211_s18   ;;  %s820_s17 = sphi %s875_s17, %s1210_s17   ;;  %s816_s16 = sphi %s873_s16, %s1209_s16   ;;  %s812_s15 = sphi %s871_s15, %s1208_s15  }
   0x7   : > { %p42_p0 = scmp.ne.s32.totalorder %s816_s16, %s812_s15  ;;  %p1175_p1 = scmp.eq.s32.totalorder %s892_s19, 0 }
   0x8   : > { %p93_p3 = scmp.eq.s32.totalorder %s599_s20, 1  ;;  %p600_p5 = scmp.ge.s32.totalorder %s824_s18, 1 }
   0x9   : > { %p901_p4 = por %p1175_p1, %p42_p0  ;;  %p152_p7 = scmp.lt.s32.totalorder %s824_s18, 3 }
   0xa   : > { %p906_p6 = por %p93_p3, %p42_p0  ;;  %s826_s24 = smov [#allocation5]  }
   0xb   : > { %s1179_s21 = scalar_select %p901_p4, 1, 0 }
   0xc   : > { %s1180_s22 = scalar_select %p906_p6, 1, 0 }
   0xd   : > { %p911_p8 = pnand %p600_p5, %p152_p7  ;;  %s165_s25 = sshll.u32 %s826_s24, 4  ;;  %s166_s25 = int_to_ptr.vmem [resolvable:$true] %s165_s25 }
   0xe   : > { %s919_s26 = sadd.s32 1, %s824_s18   ;;  %s29_s30 = sadd.s32 1, %s820_s17 }
   0xf   : > { %s1181_s23 = scalar_select %p911_p8, 1, 0 }
  0x10   : > { %p627_p10 = pneg %p911_p8  ;;  %s26_s28 = ssub.s32 %s824_s18, %s919_s26 }
  0x11   : > { %p929_p12 = scmp.eq.s32.totalorder %s26_s28, 0  ;;  %p36_p13 = scmp.ne.s32.totalorder %s820_s17, %s816_s16 }
  0x12   : > { %p923_p11 = pnand %p627_p10, %p1175_p1  ;;  %s713_s5 = scalar_lea.vmem %s166_s25, 128 }
  0x13   : > { %p714_p3 = scmp.ne.s32.totalorder %s166_s25, %s713_s5  ;;  %p721_p9 = scmp.lt.s32.totalorder %s166_s25, %s166_s25 }
  0x14   : > { %p704_p0 = pneg %p923_p11  ;;  %p722_p2 = scmp.lt.s32.totalorder %s713_s5, %s713_s5 }
  0x16   : > { %p716_p5 = pnand %p714_p3, %p704_p0  ;;  %p723_p10 = por %p722_p2, %p721_p9 }
  0x18   : > { %p717_p7 = pneg %p716_p5 }
  0x1a   : > { %p724_p1 = pnand %p723_p10, %p717_p7 }
  0x1c   : > { %727 = shalt.err (!%p724_p1)
}
  0x1d   : > { %630 = dma.hbm_to_vmem [thread:$0]  (!%p923_p11), %s1171_s1, 128, %s166_s25, [#allocation6]  }
  0x1e   : > { %s946_s8 = scalar_select %p929_p12, %s820_s17, %s29_s30  }
  0x1f   : > { %p37_p1 = scmp.eq.s32.totalorder %s824_s18, 0  ;;  %p1184_p2 = scmp.eq.s32.totalorder %s892_s19, 1 }
  0x20   : > { %p640_p0 = scmp.lt.s32.totalorder %s824_s18, 2  ;;  %s176_s10 = sand.u32 1, %s820_s17  }
  0x21   : > { %p954_p9 = por %p1184_p2, %p36_p13  ;;  %p38_p3 = por %p37_p1, %p36_p13 }
  0x22   : > { %s603_s11 = sshll.u32 %s176_s10, 4  ;;  %s617_s12 = sshll.u32 %s824_s18, 8 }
  0x23   : > { %s1185_s9 = scalar_select %p954_p9, 1, 0 }
  0x24   : > { %s967_s20 = scalar_lea.hbm %s1170_s0, %s617_s12  ;;  %s180_s24 = scalar_lea.vmem [#allocation2], %s603_s11 }
  0x25   : > { %s188_s25 = sshll.u32 %s180_s24, 4  ;;  %p969_p11 = pnand %p640_p0, %p38_p3  ;;  %s189_s25 = int_to_ptr.vmem [resolvable:$true] %s188_s25 }
  0x26   : > { %s177_s28 = scalar_lea.sflag [#allocation3], %s176_s10  ;;  %s728_s29 = scalar_lea.hbm %s967_s20, 256 }
  0x27   : > { %p729_p12 = scmp.ne.s32.totalorder %s967_s20, %s728_s29  ;;  %p730_p13 = pneg %p969_p11 }
  0x28   : > { %s733_s6 = scalar_lea.hbm %s1170_s0, 512  ;;  %p734_p10 = scmp.lt.s32.totalorder %s967_s20, %s1170_s0 }
  0x29   : > { %p731_p5 = pnand %p730_p13, %p729_p12  ;;  %p735_p1 = scmp.lt.s32.totalorder %s733_s6, %s728_s29 }
  0x2b   : > { %p732_p7 = pneg %p731_p5  ;;  %p736_p2 = por %p735_p1, %p734_p10 }
  0x2d   : > { %p737_p0 = pnand %p736_p2, %p732_p7 }
  0x2f   : > { %740 = shalt.err (!%p737_p0)
}
  0x30   : > { %s741_s12 = scalar_lea.vmem %s189_s25, 256  ;;  %s827_s10 = smov [#allocation2]  }
  0x31   : > { %p742_p3 = scmp.ne.s32.totalorder %s189_s25, %s741_s12  ;;  %s746_s13 = sshll.u32 %s827_s10, 4  ;;  %s747_s13 = int_to_ptr.vmem [resolvable:$false] %s746_s13 }
  0x32   : > { %s748_s14 = scalar_lea.vmem %s747_s13, 512  ;;  %p749_p12 = scmp.lt.s32.totalorder %s189_s25, %s747_s13 }
  0x33   : > { %p744_p6 = pnand %p742_p3, %p730_p13  ;;  %p750_p5 = scmp.lt.s32.totalorder %s748_s14, %s741_s12 }
  0x35   : > { %p745_p9 = pneg %p744_p6  ;;  %p751_p4 = por %p750_p5, %p749_p12 }
  0x37   : > { %p752_p8 = pnand %p751_p4, %p745_p9 }
  0x39   : > { %755 = shalt.err (!%p752_p8)
}
  0x3a   : > { %634 = dma.hbm_to_vmem [thread:$0]  (!%p969_p11), %s967_s20, 256, %s189_s25, %s177_s28  }
  0x3b   : > { %p1187_p7 = scmp.ne.s32.totalorder %s1181_s23, 0 }
  0x3c   : > { %s990_s24 = sand.u32 (!%p1187_p7), 1, %s816_s16   ;;  %p1188_p4 = scmp.ne.s32.totalorder (!%p1187_p7), %s1179_s21, 0 }
  0x3d   : > { %197 = sbr.rel (%p1187_p7) target bundleno = 401 (0x191), region = 28  ;;  %s607_s29 = sshll.u32 (!%p1187_p7), %s990_s24, 4 }
  0x3e   : > { %s200_s30 = scalar_lea.sflag (!%p1187_p7), [#allocation3], %s990_s24  ;;  %s203_s5 = scalar_lea.vmem (!%p1187_p7), [#allocation2], %s607_s29 }
  0x42   : > { %799 = dma.done.wait (%p1188_p4), %s200_s30, 256  }
  0x43   : > { %801 = vsyncadd (%p1188_p4), %s200_s30, 4294967040  ;;  %p1189_p6 = scmp.eq.s32.totalorder %s892_s19, 0 }
  0x45   : > { %803 = dma.done.wait (%p1189_p6), [#allocation6], 128   ;;  %p1190_p8 = pmov %p1189_p6 }
  0x46   : > { %v828_v0 = vmov 2   ;;  %v829_v1 = vmov 0   ;;  %v250_v2 = vld [vmem:[#allocation5] sm:$0xff]  ;;  %s830_s23 = smov 17   ;;  %v831_v4 = vmov 1   ;;  %v1007_v5 = vld [vmem:[%s203_s5 + $0x8] sm:$0xff]  ;;  %v251_v20 = vlaneseq }
  0x47   : > { %805 = vsyncadd (%p1190_p8), [#allocation6], 4294967168  ;;  %695 = vset.pattern.permute.xlu1 %v828_v0  ;;  %693 = vset.pattern.permute.xlu0 %v829_v1  ;;  %v1004_v3 = vld [vmem:[%s203_s5] sm:$0xff]  ;;  %v832_v6 = vmov 6   ;;  %s833_s21 = smov 16   ;;  %v834_v7 = vmov 3  }
  0x48   : > { %323 = vperm.xlu1 %695, %v250_v2   ;;  %285 = vperm.xlu0 %693, %v250_v2   ;;  %s835_s20 = smov 15   ;;  %v836_v8 = vmov 4   ;;  %v837_v9 = vmov 5   ;;  %s838_s25 = smov 1   ;;  %v840_v10 = vmov 8   ;;  %v842_v11 = vmov 7  }
  0x49   : > { %s839_s27 = smov 127   ;;  %s841_s28 = smov 113   ;;  %v1024_v23 = vand.u32 127, %v251_v20 }
  0x4a   : > { %s843_s6 = smov 111   ;;  %s844_s7 = smov 112  }
  0x4b   : > { %v1027_v26 = vadd.s32 128, %v1024_v23  ;;  %v258_v27 = vand.u32 15, %v1024_v23  ;;  %vm296_vm0 = vcmp.lt.s32.totalorder %v1024_v23, 16  ;;  %vm275_vm1 = vcmp.ge.s32.totalorder %v1024_v23, 16  ;;  %s227_s11 = scalar_lea.vmem [#allocation7], %s607_s29  ;;  %s618_s12 = sshll.u32 %s892_s19, 8 }
  0x4c   : > { %268 = vrot.lane.b32.xlu1 %v1004_v3, %s830_s23  ;;  %694 = vset.pattern.permute.xlu0 %v831_v4  ;;  %vm272_vm3 = vcmp.lt.s32.totalorder %v1024_v23, 17  ;;  %vm313_vm4 = vcmp.lt.s32.totalorder %v1024_v23, 15  ;;  %vm334_vm9 = vcmp.lt.s32.totalorder %v1024_v23, 1  ;;  %vm359_vm11 = vcmp.lt.s32.totalorder %v1024_v23, 127  ;;  %s463_s14 = scalar_lea.hbm %s1172_s2, %s618_s12  ;;  %s465_s30 = sshll.u32 %s227_s11, 4  ;;  %s466_s30 = int_to_ptr.vmem [resolvable:$true] %s465_s30 }
  0x4d   : > { %302 = vperm.xlu0 %694, %v250_v2   ;;  %699 = vset.pattern.permute.xlu1 %v832_v6  ;;  %v265_v29 = vand.u32 15, %v1027_v26  ;;  %vm1033_vm2 = vcmp.ge.s32.totalorder %v258_v27, 1  ;;  %vm1041_vm5 = vcmp.lt.s32.totalorder %v258_v27, 15  ;;  %vm376_vm12 = vcmp.lt.s32.totalorder %v1024_v23, 113  ;;  %s443_s5 = scalar_lea.sflag [#allocation4], %s990_s24  ;;  %p1205_p11 = scmp.ne.s32.totalorder %s1185_s9, 0 }
  0x4e   : > { %vm1055_vm7 = vmand %vm275_vm1, %vm1033_vm2  ;;  %vm380_vm13 = vcmp.lt.s32.totalorder %v1027_v26, 240  ;;  %vm397_vm15 = vcmp.lt.s32.totalorder %v1024_v23, 112 }
  0x4f   : > { %vm1047_vm6 = vcmp.ge.s32.totalorder %v265_v29, 1  ;;  %vm1059_vm8 = vcmp.lt.s32.totalorder %v265_v29, 15  ;;  %vm1068_vm10 = vmand %vm275_vm1, %vm1041_vm5 }
  0x50   : > { %270 = vrot.lane.b32.xlu1 %v1007_v5, %s830_s23  ;;  %vm1097_vm14 = vmand %vm380_vm13, %vm1047_vm6  ;;  %s756_s23 = scalar_lea.vmem %s466_s30, 256 }
  0x51   : > { %292 = vrot.lane.b32.xlu0 %v1004_v3, %s833_s21  ;;  %p757_p9 = scmp.ne.s32.totalorder %s466_s30, %s756_s23 }
  0x52   : > { %696 = vset.pattern.permute.xlu0 %v834_v7 }
  0x53   : > { %p758_p13 = pnand %p757_p9, %p1205_p11 }
  0x54   : > { %294 = vrot.lane.b32.xlu1 %v1007_v5, %s833_s21  ;;  %s845_s21 = smov [#allocation7]  }
  0x55   : > { %340 = vperm.xlu0 %696, %v250_v2   ;;  %p759_p10 = pneg %p758_p13  ;;  %s760_s29 = sshll.u32 %s845_s21, 4  ;;  %s761_s29 = int_to_ptr.vmem [resolvable:$false] %s760_s29 }
  0x56   : > { %p763_p1 = scmp.lt.s32.totalorder %s466_s30, %s761_s29 }
  0x58   : > { %309 = vrot.lane.b32.xlu1 %v1004_v3, %s835_s20 }
  0x59   : > { %697 = vset.pattern.permute.xlu0 %v836_v8 }
  0x5a   : > { %348 = vperm.xlu0 %697, %v250_v2  }
  0x5c   : > { %311 = vrot.lane.b32.xlu1 %v1007_v5, %s835_s20  ;;  %s762_s20 = scalar_lea.vmem %s761_s29, 512 }
  0x5d   : > { %p764_p2 = scmp.lt.s32.totalorder %s762_s20, %s756_s23 }
  0x5e   : > { %698 = vset.pattern.permute.xlu0 %v837_v9 }
  0x5f   : > { %365 = vperm.xlu0 %698, %v250_v2   ;;  %p765_p0 = por %p764_p2, %p763_p1 }
  0x60   : > { %330 = vrot.lane.b32.xlu1 %v1004_v3, %s838_s25 }
  0x61   : > { %p766_p3 = pnand %p765_p0, %p759_p10 }
  0x63   : > { %357 = vrot.lane.b32.xlu0 %v1007_v5, %s839_s27 }
  0x64   : > { %332 = vrot.lane.b32.xlu1 %v1007_v5, %s838_s25  ;;  %701 = vset.pattern.permute.xlu0 %v840_v10 }
  0x67   : > { %372 = vrot.lane.b32.xlu0 %v1004_v3, %s841_s28 }
  0x68   : > { %386 = vperm.xlu1 %699, %v250_v2  }
  0x6b   : > { %422 = vperm.xlu0 %701, %v250_v2  }
  0x6c   : > { %355 = vrot.lane.b32.xlu1 %v1004_v3, %s839_s27 }
  0x6d   : > { %700 = vset.pattern.permute.xlu1 %v842_v11 }
  0x6f   : > { %410 = vrot.lane.b32.xlu0 %v1004_v3, %s843_s6 }
  0x70   : > { %403 = vperm.xlu1 %700, %v250_v2  }
  0x74   : > { %374 = vrot.lane.b32.xlu1 %v1007_v5, %s841_s28 }
  0x78   : > { %393 = vrot.lane.b32.xlu1 %v1004_v3, %s844_s7 }
  0x7c   : > { %395 = vrot.lane.b32.xlu1 %v1007_v5, %s844_s7 }
  0x80   : > { %412 = vrot.lane.b32.xlu1 %v1007_v5, %s843_s6 }
  0xc3   : > { %v324_v12 = vpop.permute.xlu1 %323  ;;  %v286_v13 = vpop.permute.xlu0 %285 }
  0xc7   : > { %v269_v14 = vpop.permute.xlu1 %268 }
  0xc8   : > { %v303_v16 = vpop.permute.xlu0 %302 }
  0xcb   : > { %v271_v15 = vpop.permute.xlu1 %270 }
  0xcc   : > { %v293_v18 = vpop.permute.xlu0 %292  ;;  %v273_v38 = vsel %vm272_vm3, %v269_v14, %v271_v15  ;;  %v274_v39 = vsel %vm272_vm3, %v271_v15, %v269_v14 }
  0xcd   : > { %v281_v49 = vsel %vm1055_vm7, %v274_v39, 0.0  ;;  %v282_v50 = vsel %vm1047_vm6, %v273_v38, 0.0 }
  0xce   : > { %v288_v58 = vmul.f32 %v286_v13, %v281_v49  ;;  %v289_v59 = vmul.f32 %v286_v13, %v282_v50 }
  0xcf   : > { %v295_v17 = vpop.permute.xlu1 %294 }
  0xd0   : > { %v341_v22 = vpop.permute.xlu0 %340  ;;  %v298_v34 = vsel %vm296_vm0, %v295_v17, %v293_v18  ;;  %v297_v44 = vsel %vm296_vm0, %v293_v18, %v295_v17  ;;  %vm414_vm0 = vcmp.lt.s32.totalorder %v1024_v23, 111 }
  0xd1   : > { %v299_v45 = vsel %vm275_vm1, %v298_v34, 0.0  ;;  %v306_v54 = vmul.f32 %v303_v16, %v297_v44  ;;  %vm418_vm1 = vmand %vm380_vm13, %vm1059_vm8 }
  0xd2   : > { %v305_v53 = vmul.f32 %v303_v16, %v299_v45 }
  0xd3   : > { %v310_v19 = vpop.permute.xlu1 %309  ;;  %v308_v63 = vadd.f32 %v306_v54, %v289_v59 }
  0xd4   : > { %v307_v62 = vadd.f32 %v305_v53, %v288_v58 }
  0xd5   : > { %v349_v25 = vpop.permute.xlu0 %348 }
  0xd6   : > { %v351_v10 = vmul.f32 %v349_v25, %v1004_v3  ;;  %v352_v11 = vmul.f32 %v349_v25, %v1007_v5 }
  0xd7   : > { %v312_v21 = vpop.permute.xlu1 %311 }
  0xd8   : > { %v314_v41 = vsel %vm313_vm4, %v310_v19, %v312_v21  ;;  %v315_v42 = vsel %vm313_vm4, %v312_v21, %v310_v19 }
  0xd9   : > { %v320_v51 = vsel %vm1068_vm10, %v315_v42, 0.0  ;;  %v321_v52 = vsel %vm1059_vm8, %v314_v41, 0.0 }
  0xda   : > { %v366_v31 = vpop.permute.xlu0 %365  ;;  %v326_v60 = vmul.f32 %v324_v12, %v320_v51  ;;  %v327_v61 = vmul.f32 %v324_v12, %v321_v52 }
  0xdb   : > { %v331_v24 = vpop.permute.xlu1 %330 }
  0xdc   : > { %v328_v8 = vadd.f32 %v326_v60, %v307_v62  ;;  %v329_v9 = vadd.f32 %v327_v61, %v308_v63 }
  0xde   : > { %v358_v48 = vpop.permute.xlu0 %357 }
  0xdf   : > { %v333_v28 = vpop.permute.xlu1 %332 }
  0xe0   : > { %v335_v46 = vsel %vm334_vm9, %v331_v24, %v333_v28  ;;  %v336_v47 = vsel %vm334_vm9, %v333_v28, %v331_v24 }
  0xe1   : > { %v337_v56 = vsel %vm1033_vm2, %v336_v47, 0.0  ;;  %v338_v57 = vsel %vm1047_vm6, %v335_v46, 0.0 }
  0xe2   : > { %v343_v0 = vmul.f32 %v341_v22, %v337_v56  ;;  %v344_v1 = vmul.f32 %v341_v22, %v338_v57  ;;  %v373_v2 = vpop.permute.xlu0 %372 }
  0xe3   : > { %v1037_v32 = vpop.permute.xlu1 %386 }
  0xe4   : > { %v345_v15 = vadd.f32 %v343_v0, %v328_v8  ;;  %v346_v16 = vadd.f32 %v344_v1, %v329_v9 }
  0xe6   : > { %v423_v18 = vpop.permute.xlu0 %422  ;;  %v353_v24 = vadd.f32 %v351_v10, %v345_v15  ;;  %v354_v25 = vadd.f32 %v352_v11, %v346_v16 }
  0xe7   : > { %v356_v43 = vpop.permute.xlu1 %355 }
  0xe8   : > { %v360_v6 = vsel %vm359_vm11, %v356_v43, %v358_v48  ;;  %v361_v7 = vsel %vm359_vm11, %v358_v48, %v356_v43 }
  0xe9   : > { %v362_v3 = vsel %vm1041_vm5, %v360_v6, 0.0  ;;  %v363_v5 = vsel %vm1059_vm8, %v361_v7, 0.0 }
  0xea   : > { %v368_v21 = vmul.f32 %v366_v31, %v362_v3  ;;  %v369_v22 = vmul.f32 %v366_v31, %v363_v5  ;;  %v411_v36 = vpop.permute.xlu0 %410 }
  0xeb   : > { %v404_v55 = vpop.permute.xlu1 %403 }
  0xec   : > { %v370_v38 = vadd.f32 %v368_v21, %v353_v24  ;;  %v371_v39 = vadd.f32 %v369_v22, %v354_v25 }
  0xef   : > { %v375_v4 = vpop.permute.xlu1 %374 }
  0xf0   : > { %v377_v13 = vsel %vm376_vm12, %v373_v2, %v375_v4  ;;  %v378_v14 = vsel %vm376_vm12, %v375_v4, %v373_v2 }
  0xf1   : > { %v383_v19 = vsel %vm1033_vm2, %v377_v13, 0.0  ;;  %v384_v20 = vsel %vm1097_vm14, %v378_v14, 0.0 }
  0xf2   : > { %v389_v28 = vmul.f32 %v1037_v32, %v383_v19  ;;  %v390_v29 = vmul.f32 %v1037_v32, %v384_v20 }
  0xf3   : > { %v394_v17 = vpop.permute.xlu1 %393 }
  0xf4   : > { %v391_v32 = vadd.f32 %v389_v28, %v370_v38  ;;  %v392_v42 = vadd.f32 %v390_v29, %v371_v39 }
  0xf7   : > { %v396_v27 = vpop.permute.xlu1 %395 }
  0xf8   : > { %v398_v34 = vsel %vm397_vm15, %v394_v17, %v396_v27  ;;  %v399_v35 = vsel %vm397_vm15, %v396_v27, %v394_v17 }
  0xf9   : > { %v401_v30 = vsel %vm380_vm13, %v399_v35, 0.0  ;;  %v406_v40 = vmul.f32 %v404_v55, %v398_v34 }
  0xfa   : > { %v407_v41 = vmul.f32 %v404_v55, %v401_v30 }
  0xfb   : > { %v413_v31 = vpop.permute.xlu1 %412  ;;  %v408_v23 = vadd.f32 %v406_v40, %v391_v32 }
  0xfc   : > { %v415_v43 = vsel %vm414_vm0, %v411_v36, %v413_v31  ;;  %v416_v44 = vsel %vm414_vm0, %v413_v31, %v411_v36  ;;  %v409_v47 = vadd.f32 %v407_v41, %v392_v42 }
  0xfd   : > { %v419_v45 = vsel %vm1041_vm5, %v415_v43, 0.0  ;;  %v420_v46 = vsel %vm418_vm1, %v416_v44, 0.0 }
  0xfe   : > { %v425_v48 = vmul.f32 %v423_v18, %v419_v45  ;;  %v426_v49 = vmul.f32 %v423_v18, %v420_v46 }
 0x100   : > { %v427_v37 = vadd.f32 %v425_v48, %v408_v23  ;;  %v428_v50 = vadd.f32 %v426_v49, %v409_v47 }
 0x102   : > { %v431_v26 = vadd.f32 %v428_v50, %v427_v37  ;;  %v436_v51 = vmul.f32 %v427_v37, %v427_v37  ;;  %v437_v52 = vmul.f32 %v428_v50, %v428_v50  ;;  %429 = vst [vmem:[%s227_s11] sm:$0xff] %v427_v37  ;;  %430 = vst [vmem:[%s227_s11 + $0x8] sm:$0xff] %v428_v50 }
 0x104   : > { %432 = vadd.xlane.f32.xlu0 %v431_v26  ;;  %v438_v33 = vadd.f32 %v437_v52, %v436_v51 }
 0x106   : > { %439 = vadd.xlane.f32.xlu1 %v438_v33 }
 0x107   : > { %769 = shalt.err (!%p766_p3)
}
 0x108   : > { %s770_s25 = scalar_lea.hbm %s463_s14, 256  ;;  %s774_s28 = scalar_lea.hbm %s1172_s2, 512 }
 0x109   : > { %p771_p12 = scmp.ne.s32.totalorder %s463_s14, %s770_s25  ;;  %p775_p4 = scmp.lt.s32.totalorder %s463_s14, %s1172_s2 }
 0x10a   : > { %p776_p6 = scmp.lt.s32.totalorder %s774_s28, %s770_s25 }
 0x10b   : > { %p772_p5 = pnand %p771_p12, %p1205_p11 }
 0x10c   : > { %p777_p8 = por %p776_p6, %p775_p4 }
 0x10d   : > { %p773_p7 = pneg %p772_p5 }
 0x10f   : > { %p778_p9 = pnand %p777_p8, %p773_p7 }
 0x111   : > { %781 = shalt.err (!%p778_p9)
}
 0x112   : > { %625 = dma.vmem_to_hbm [thread:$0]  (%p1205_p11), %s466_s30, 256, %s463_s14, %s443_s5   ;;  %vm434_vm2 = vcmask 7168  }
 0x113   : > { %p240_p13 = scmp.lt.s32.totalorder %s892_s19, 1 }
 0x115   : > { %s1213_s19 = smov (!%p240_p13, %s892_s19), 1 }
 0x116   : > { %s610_s11 = sshll.u32 %s1213_s19, 3 }
 0x117   : > { %s243_s13 = scalar_lea.vmem %s1173_s3, %s610_s11  ;;  %s247_s29 = scalar_lea.vmem %s1174_s4, %s610_s11 }
 0x18d   : > { %v433_v53 = vpop.xlane.xlu0 %432 }
 0x18e   : > { %435 = vst.msk [vmem:[%s243_s13] sm:$0xff] %vm434_vm2, %v433_v53 }
 0x18f   : > { %v440_v54 = vpop.xlane.xlu1 %439 }
 0x190   : > { %441 = vst.msk [vmem:[%s247_s29] sm:$0xff] %vm434_vm2, %v440_v54 }
 0x191 PF: > { %s483_s9 = sand.u32 1, %s812_s15   ;;  %p1206_p11 = scmp.ne.s32.totalorder %s1180_s22, 0 }
 0x192   : > { %p1207_p10 = scmp.ge.s32.totalorder %s824_s18, 2  ;;  %s484_s19 = scalar_lea.sflag [#allocation4], %s483_s9 }
 0x194   : > { %p636_p1 = pnand %p1207_p10, %p1206_p11 }
 0x196   : > { %p637_p2 = pneg %p636_p1 }
 0x198   : > { %807 = dma.done.wait (%p637_p2), %s484_s19, 256  }
 0x199   : > { %809 = vsyncadd (%p637_p2), %s484_s19, 4294967040  ;;  %p19_p0 = scmp.ge.s32.totalorder %s919_s26, 4   ;;  %s1208_s15 = smov %s816_s16 }
 0x19a   : > { %s1209_s16 = smov %s820_s17  ;;  %s1210_s17 = smov %s946_s8 }
 0x19b   : > { %s1211_s18 = smov %s919_s26  ;;  %21 = sbr.rel (!%p19_p0) target bundleno = 6 (0x6), region = 101 }
 0x1a0   :  { %503 = vsyncpa [#allocation3], 1 }
 0x1a1   :  { %505 = vsyncpa [#allocation3 + $0x1], 1 }
 0x1a2   :  { %506 = vsyncpa [#allocation6], 1 }
 0x1a3   :  { %507 = vsyncpa [#allocation4], 1 }
 0x1a4   :  { %509 = vsyncpa [#allocation4 + $0x1], 1 }

</bundles_post_ra>
